<compile_context>
chip_gen: v5e
topology: v5e:2x2
jax: 0.10.0
libtpu: 0.0.40
codegen_flags: <defaults>
</compile_context>

<pallas_src>
import jax
import jax.numpy as jnp
from jax.experimental import pallas as pl
from jax.experimental.pallas import tpu as pltpu

PAD_IDX = 0
_LANES = 128


def _logreg_kernel(ids_ref, emb_ref, w_ref, bias_ref, out_ref, acc_ref):
    # ids_ref : (B, S) int32, SMEM (scalar-prefetched; also consumed by the index_maps)
    # emb_ref : (1, 1, Dp) f32  -- embedding row for token ids[b, s], gathered by DMA
    # w_ref   : (1, Dp)    f32  -- fc weight in PyTorch (out=1, in=D) layout, zero-padded
    # bias_ref: (1, 1)     f32, SMEM
    # out_ref : (1, 1, 128) f32 -- lane-dense output slab for batch row b
    # acc_ref : (1, Dp)    f32 VMEM scratch -- running sum over the sequence
    s = pl.program_id(1)
    seq_len = ids_ref.shape[1]

    @pl.when(s == 0)
    def _init():
        acc_ref[...] = jnp.zeros_like(acc_ref)

    # Accumulate the gathered embedding row for this (b, s).
    acc_ref[...] += emb_ref[0]

    @pl.when(s == seq_len - 1)
    def _finalize():
        # mean over the sequence (PyTorch mean(dim=1), pads included via zeroed row)
        pooled = acc_ref[...] * (1.0 / seq_len)                       # (1, Dp)
        logit = jnp.sum(pooled * w_ref[...], axis=-1, keepdims=True)  # (1, 1)
        logit = logit + bias_ref[0, 0]
        # Broadcast across 128 lanes -> unmasked, lane-dense store.
        out_ref[...] = jnp.broadcast_to(logit, out_ref.shape)


def logistic_regression_forward(x, embedding, fc_weight, fc_bias):
    """Forward pass of LogisticRegression.

    x         : (B, S) int token ids
    embedding : (V, D) f32 table (row PAD_IDX zeroed, as nn.Embedding(padding_idx=0))
    fc_weight : (1, D) f32 (PyTorch nn.Linear weight layout)
    fc_bias   : (1, 1) f32
    returns   : (B,)   f32  == fc(embedding(x).mean(dim=1)).squeeze(1)
    """
    B, S = x.shape
    V, D = embedding.shape
    Dp = ((D + _LANES - 1) // _LANES) * _LANES  # lane-align the feature dim

    # Padding is a no-op when D is already a multiple of 128 (real model dims);
    # padded weight lanes are zero so the result is unchanged.
    if Dp != D:
        embedding = jnp.pad(embedding, ((0, 0), (0, Dp - D)))
        fc_weight = jnp.pad(fc_weight, ((0, 0), (0, Dp - D)))
    emb3 = embedding.reshape(V, 1, Dp).astype(jnp.float32)
    w = fc_weight.reshape(1, Dp).astype(jnp.float32)
    bias = jnp.asarray(fc_bias, jnp.float32).reshape(1, 1)
    ids = jnp.clip(x.astype(jnp.int32), 0, V - 1)  # guard the gather against OOB ids

    out = pl.pallas_call(
        _logreg_kernel,
        out_shape=jax.ShapeDtypeStruct((B, 1, _LANES), jnp.float32),
        grid_spec=pltpu.PrefetchScalarGridSpec(
            num_scalar_prefetch=1,   # ids -> SMEM, visible to every index_map
            grid=(B, S),             # batch (parallel) x sequence (reduction)
            in_specs=[
                # Gather exactly one embedding row per step, selected by ids[b, s].
                pl.BlockSpec((1, 1, Dp), lambda b, s, ids: (ids[b, s], 0, 0)),
                # fc weight: single block, stays resident across the grid.
                pl.BlockSpec((1, Dp), lambda b, s, ids: (0, 0)),
                # bias scalar lives in SMEM.
                pl.BlockSpec(memory_space=pltpu.MemorySpace.SMEM),
            ],
            out_specs=pl.BlockSpec((1, 1, _LANES), lambda b, s, ids: (b, 0, 0)),
            scratch_shapes=[pltpu.VMEM((1, Dp), jnp.float32)],
        ),
        compiler_params=pltpu.CompilerParams(
            dimension_semantics=("parallel", "arbitrary")),
    )(ids, emb3, w, bias)
    return out[:, 0, 0]  # == .squeeze(1)


def _reference_forward(x, embedding, fc_weight, fc_bias):
    emb = jnp.take(embedding, x, axis=0)          # (B, S, D)
    pooled = jnp.mean(emb, axis=1)                # (B, D)
    return jnp.sum(pooled * fc_weight, axis=-1) + fc_bias.reshape(())


if __name__ == "__main__":
    # Small shapes consistent with the module's forward.
    B, S = 2, 8          # batch, sequence length
    V, D = 32, 32        # vocab_size, embed_dim

    key = jax.random.PRNGKey(0)
    k_emb, k_w, k_b, k_x = jax.random.split(key, 4)

    # nn.Embedding(padding_idx=PAD_IDX) zeroes that row at init.
    embedding = jax.random.normal(k_emb, (V, D), dtype=jnp.float32)
    embedding = embedding.at[PAD_IDX].set(0.0)
    fc_weight = jax.random.normal(k_w, (1, D), dtype=jnp.float32) * 0.1
    fc_bias = jax.random.normal(k_b, (1, 1), dtype=jnp.float32) * 0.1

    # Deterministic token input, including some PAD_IDX tokens.
    x = jax.random.randint(k_x, (B, S), 0, V, dtype=jnp.int32)
    x = x.at[0, -2:].set(PAD_IDX)

    out = logistic_regression_forward(x, embedding, fc_weight, fc_bias)
    out = jax.block_until_ready(out)

    ref = _reference_forward(x, embedding, fc_weight, fc_bias)
    assert out.shape == (B,)
    assert jnp.allclose(out, ref, atol=1e-5, rtol=1e-5), (out, ref)

    print("KERNEL_OK")
</pallas_src>

<mosaic_0001>
module attributes {stable_mosaic.version = 11 : i64} {
  func.func @_logreg_kernel(%arg0: i32, %arg1: i32, %arg2: memref<2x8xi32, #tpu.memory_space<smem>>, %arg3: memref<1x1x128xf32, #tpu.memory_space<vmem>>, %arg4: memref<1x128xf32, #tpu.memory_space<vmem>>, %arg5: memref<1x1xf32, #tpu.memory_space<smem>>, %arg6: memref<1x1x128xf32, #tpu.memory_space<vmem>>, %arg7: memref<1x128xf32, #tpu.memory_space<vmem>>) attributes {dimension_semantics = [#tpu.dimension_semantics<parallel>, #tpu.dimension_semantics<arbitrary>], iteration_bounds = array<i64: 2, 8>, scalar_prefetch = 1 : i64, scratch_operands = 1 : i64, tpu.core_type = #tpu.core_type<tc>, window_params = [{transform_indices = @transform_0, window_bounds = array<i64: 1, 1, 128>}, {pipeline_mode = #tpu.pipeline_mode<synchronous>, transform_indices = @transform_1, window_bounds = array<i64: 1, 128>}, {transform_indices = @transform_2, window_bounds = array<i64: 1, 1>}, {transform_indices = @transform_3, window_bounds = array<i64: 1, 1, 128>}]} {
    %c0_i32 = arith.constant 0 : i32
    %0 = arith.cmpi eq, %arg1, %c0_i32 : i32
    %1 = arith.extui %0 : i1 to i32
    %c0_i32_0 = arith.constant 0 : i32
    %2 = arith.cmpi ne, %1, %c0_i32_0 : i32
    scf.if %2 {
      %cst = arith.constant 0.000000e+00 : f32
      %11 = vector.broadcast %cst : f32 to vector<1x128xf32>
      %c0_8 = arith.constant 0 : index
      %c0_9 = arith.constant 0 : index
      %12 = vector.load %arg7[%c0_8, %c0_9] : memref<1x128xf32, #tpu.memory_space<vmem>>, vector<1x128xf32>
      tpu.vector_store %arg7[%c0_8, %c0_9], %11 {strides = array<i32>} : memref<1x128xf32, #tpu.memory_space<vmem>>, vector<1x128xf32>,
    } else {
    }
    %c0 = arith.constant 0 : index
    %c0_1 = arith.constant 0 : index
    %3 = vector.load %arg7[%c0, %c0_1] : memref<1x128xf32, #tpu.memory_space<vmem>>, vector<1x128xf32>
    %c0_2 = arith.constant 0 : index
    %c0_3 = arith.constant 0 : index
    %c0_4 = arith.constant 0 : index
    %4 = vector.load %arg3[%c0_2, %c0_3, %c0_4] : memref<1x1x128xf32, #tpu.memory_space<vmem>>, vector<1x1x128xf32>
    %5 = vector.shape_cast %4 : vector<1x1x128xf32> to vector<1x128xf32>
    %6 = arith.addf %3, %5 : vector<1x128xf32>
    %c0_5 = arith.constant 0 : index
    %c0_6 = arith.constant 0 : index
    %7 = vector.load %arg7[%c0_5, %c0_6] : memref<1x128xf32, #tpu.memory_space<vmem>>, vector<1x128xf32>
    tpu.vector_store %arg7[%c0_5, %c0_6], %6 {strides = array<i32>} : memref<1x128xf32, #tpu.memory_space<vmem>>, vector<1x128xf32>,
    %c7_i32 = arith.constant 7 : i32
    %8 = arith.cmpi eq, %arg1, %c7_i32 : i32
    %9 = arith.extui %8 : i1 to i32
    %c0_i32_7 = arith.constant 0 : i32
    %10 = arith.cmpi ne, %9, %c0_i32_7 : i32
    scf.if %10 {
      %c0_8 = arith.constant 0 : index
      %c0_9 = arith.constant 0 : index
      %11 = vector.load %arg7[%c0_8, %c0_9] : memref<1x128xf32, #tpu.memory_space<vmem>>, vector<1x128xf32>
      %cst = arith.constant 1.250000e-01 : f32
      %12 = vector.broadcast %cst : f32 to vector<1x128xf32>
      %13 = arith.mulf %11, %12 : vector<1x128xf32>
      %c0_10 = arith.constant 0 : index
      %c0_11 = arith.constant 0 : index
      %14 = vector.load %arg4[%c0_10, %c0_11] : memref<1x128xf32, #tpu.memory_space<vmem>>, vector<1x128xf32>
      %15 = arith.mulf %13, %14 : vector<1x128xf32>
      %cst_12 = arith.constant dense<0.000000e+00> : vector<1xf32>
      %16 = vector.multi_reduction <add>, %15, %cst_12 [1] : vector<1x128xf32> to vector<1xf32>
      %17 = vector.shape_cast %16 : vector<1xf32> to vector<1x1xf32>
      %c0_13 = arith.constant 0 : index
      %c0_14 = arith.constant 0 : index
      %18 = memref.load %arg5[%c0_13, %c0_14] : memref<1x1xf32, #tpu.memory_space<smem>>
      %19 = vector.broadcast %18 : f32 to vector<1x1xf32>
      %20 = arith.addf %17, %19 : vector<1x1xf32>
      %21 = vector.shape_cast %20 : vector<1x1xf32> to vector<1x1x1xf32>
      %22 = vector.broadcast %21 : vector<1x1x1xf32> to vector<1x1x128xf32>
      %c0_15 = arith.constant 0 : index
      %c0_16 = arith.constant 0 : index
      %c0_17 = arith.constant 0 : index
      %23 = vector.load %arg6[%c0_15, %c0_16, %c0_17] : memref<1x1x128xf32, #tpu.memory_space<vmem>>, vector<1x1x128xf32>
      tpu.vector_store %arg6[%c0_15, %c0_16, %c0_17], %22 {strides = array<i32>} : memref<1x1x128xf32, #tpu.memory_space<vmem>>, vector<1x1x128xf32>,
    } else {
    }
    return
  }
  func.func @transform_0(%arg0: i32, %arg1: i32, %arg2: memref<2x8xi32, #tpu.memory_space<smem>>) -> (i32, i32, i32) {
    %0 = arith.index_cast %arg0 : i32 to index
    %1 = arith.index_cast %arg1 : i32 to index
    %2 = memref.load %arg2[%0, %1] : memref<2x8xi32, #tpu.memory_space<smem>>
    %c0_i32 = arith.constant 0 : i32
    %c0_i32_0 = arith.constant 0 : i32
    %c0_i32_1 = arith.constant 0 : i32
    return %2, %c0_i32, %c0_i32_0 : i32, i32, i32
  }
  func.func @transform_1(%arg0: i32, %arg1: i32, %arg2: memref<2x8xi32, #tpu.memory_space<smem>>) -> (i32, i32) {
    %c0_i32 = arith.constant 0 : i32
    %c0_i32_0 = arith.constant 0 : i32
    %c0_i32_1 = arith.constant 0 : i32
    return %c0_i32, %c0_i32_0 : i32, i32
  }
  func.func @transform_2(%arg0: i32, %arg1: i32, %arg2: memref<2x8xi32, #tpu.memory_space<smem>>) -> (i32, i32) {
    %c0_i32 = arith.constant 0 : i32
    %c0_i32_0 = arith.constant 0 : i32
    %c0_i32_1 = arith.constant 0 : i32
    return %c0_i32, %c0_i32_0 : i32, i32
  }
  func.func @transform_3(%arg0: i32, %arg1: i32, %arg2: memref<2x8xi32, #tpu.memory_space<smem>>) -> (i32, i32, i32) {
    %c0_i32 = arith.constant 0 : i32
    %c0_i32_0 = arith.constant 0 : i32
    %c0_i32_1 = arith.constant 0 : i32
    return %arg0, %c0_i32, %c0_i32_0 : i32, i32, i32
  }
}

</mosaic_0001>

<bundles_post_ra>
// kernel: tpu_custom_call.1
= control target key start
LH: loop header
LB: loop body
LE: loop exit
PB: predicated region body
PF: predicated region fallthrough
CT: control target
= control target key end

     0   :  { %s636_s20 = smov [#allocation4]   ;;  %s883_s0 = inlined_call_operand.vmem [shape: s32[2,8], index: 0, kind: input, shape index: {}]   ;;  %s884_s1 = inlined_call_operand.hbm [shape: f32[32,1,128], index: 1, kind: input, shape index: {}]   ;;  %s885_s2 = inlined_call_operand.vmem [shape: f32[1,128], index: 2, kind: input, shape index: {}]   ;;  %s886_s3 = inlined_call_operand.<no memory space> [shape: f32[1,1], index: 3, kind: input, shape index: {}]   ;;  %s887_s4 = inlined_call_operand.hbm [shape: f32[2,1,128], index: 4, kind: output, shape index: {}]  }
   0x1   :  { %s10_s17 = sshll.u32 %s883_s0, 4  ;;  %14 = sst [smem:[#allocation5]] %s886_s3  ;;  %s11_s17 = int_to_ptr.vmem [resolvable:$true] %s10_s17 }
   0x2   :  { %13 = dma.vmem_to_smem %s11_s17, 32, %s636_s20, [#allocation3] }
   0x3   :  { %582 = dma.done.wait [#allocation3], 32 }
   0x4   :  { %583 = vsyncadd [#allocation3], 4294967264 }
   0x5   :  { %17 = sfence }
   0x6   :  { %18 = vsyncpa [#allocation7], 0 }
   0x7   :  { %20 = vsyncpa [#allocation7 + $0x1], 0 }
   0x8   :  { %21 = vsyncpa [#allocation8], 0 }
   0x9   :  { %23 = vsyncpa [#allocation8 + $0x1], 0  ;;  %s669_s21 = smov 0   ;;  %s671_s22 = smov 0  }
   0xa   :  { %s673_s23 = smov 0   ;;  %s675_s0 = smov 0  }
   0xb   :  { %s677_s24 = smov 0   ;;  %s679_s3 = smov 0  }
   0xc   :  { %s681_s25 = smov 0   ;;  %s683_s26 = smov 0  }
   0xd   :  { %s685_s27 = smov 0   ;;  %s687_s28 = smov 0  }
   0xe   :  { %s689_s29 = smov 0  }
   0xf LB: > { %893 = sst [smem:[#allocation15_spill]] %s614_s3  ;;  %s348_s30 = sadd.s32 4294967295, %s634_s29   ;;  %s634_s29 = sphi %s689_s29, %s29_s29   ;;  %s630_s28 = sphi %s687_s28, %s910_s28   ;;  %s626_s27 = sphi %s685_s27, %s909_s27   ;;  %s622_s26 = sphi %s683_s26, %s908_s26   ;;  %s618_s25 = sphi %s681_s25, %s907_s25   ;;  %s614_s3 = sphi %s679_s3, %s906_s3   ;;  %s610_s24 = sphi %s677_s24, %s915_s24   ;;  %s606_s0 = sphi %s675_s0, %s914_s0   ;;  %s602_s23 = sphi %s673_s23, %s913_s23   ;;  %s598_s22 = sphi %s671_s22, %s912_s22   ;;  %s594_s21 = sphi %s669_s21, %s911_s21  }
  0x10   : > { %894 = sst [smem:[#allocation16_spill]] %s626_s27  ;;  %s349_s5 = sadd.s32 4294967294, %s634_s29  }
  0x11   : > { %895 = sst [smem:[#allocation17_spill]] %s630_s28  ;;  %s38_s6 = sadd.s32 1, %s626_s27 }
  0x12   : > { %s41_s7 = sadd.s32 1, %s630_s28  ;;  %p39_p0 = scmp.ge.s32.totalorder %s38_s6, 8 }
  0x13   : > { %s45_s8 = sshra.s32 %s626_s27, 7  ;;  %s50_s10 = sand.u32 127, %s626_s27 }
  0x14   : > { %s47_s9 = sadd.s32 %s630_s28, %s45_s8  ;;  %s917_s6 = smov (%p39_p0, %s38_s6), 0 }
  0x15   : > { %896 = sst [smem:[#allocation18_spill]] %s917_s6  ;;  %s919_s7 = smov (!%p39_p0, %s41_s7), %s630_s28 }
  0x16   : > { %s350_s11 = sshll.u32 %s47_s9, 7  ;;  %s53_s12 = sshra.s32 %s917_s6, 7 }
  0x17   : > { %p43_p1 = scmp.ge.s32.totalorder %s919_s7, 2  ;;  %s735_s13 = sadd.s32 %s350_s11, %s50_s10 }
  0x18   : > { %s52_s14 = sld [smem:[#allocation4 + %s735_s13]]  ;;  %s58_s15 = sand.u32 127, %s917_s6 }
  0x19   : > { %s921_s7 = smov (%p43_p1, %s919_s7), 0  ;;  %s64_s16 = sadd.s32 1, %s614_s3 }
  0x1a   : > { %897 = sst [smem:[#allocation19_spill]] %s921_s7  ;;  %p71_p2 = scmp.ne.s32.totalorder %s614_s3, %s610_s24 }
  0x1b   : > { %s55_s17 = sadd.s32 %s53_s12, %s921_s7  ;;  %p72_p3 = scmp.eq.s32.totalorder %s634_s29, 0 }
  0x1c   : > { %s351_s18 = sshll.u32 %s55_s17, 7  ;;  %p77_p4 = scmp.ne.s32.totalorder %s610_s24, %s606_s0 }
  0x1d   : > { %s59_s19 = sadd.s32 %s351_s18, %s58_s15  ;;  %p748_p5 = por %p72_p3, %p71_p2 }
  0x1e   : > { %s60_s8 = sld [smem:[#allocation4 + %s59_s19]]  ;;  %p78_p6 = scmp.eq.s32.totalorder %s348_s30, 0 }
  0x1f   : > { %s129_s9 = ssub.s32 %s630_s28, %s921_s7  ;;  %s132_s10 = sadd.s32 1, %s602_s23 }
  0x20   : > { %p757_p7 = por %p78_p6, %p77_p4  ;;  %p130_p8 = scmp.eq.s32.totalorder %s129_s9, 0 }
  0x21   : > { %p142_p9 = scmp.ne.s32.totalorder %s602_s23, %s598_s22  ;;  %p143_p10 = scmp.eq.s32.totalorder %s348_s30, 15 }
  0x22   : > { %s766_s0 = scalar_select %p130_p8, %s602_s23, %s132_s10  }
  0x23   : > { %p768_p11 = por %p143_p10, %p142_p9  ;;  %p148_p12 = scmp.ne.s32.totalorder %s598_s22, %s594_s21 }
  0x24   : > { %s61_s15 = ssub.s32 %s52_s14, %s60_s8  ;;  %p149_p13 = scmp.eq.s32.totalorder %s349_s5, 15 }
  0x25   : > { %p62_p0 = scmp.eq.s32.totalorder %s61_s15, 0  ;;  %p376_p2 = scmp.lt.s32.totalorder %s634_s29, 16 }
  0x26   : > { %p776_p1 = por %p149_p13, %p148_p12  ;;  %s175_s30 = sand.u32 1, %s614_s3  }
  0x27   : > { %s782_s18 = scalar_select %p62_p0, %s614_s3, %s64_s16  }
  0x28   : > { %p787_p3 = pnand %p376_p2, %p748_p5  ;;  %s923_s13 = smov (!%p748_p5, %s735_s13), 0 }
  0x29   : > { %902 = sst [smem:[#allocation20_spill]] %s782_s18  ;;  %s927_s13 = smov (!%p376_p2, %s923_s13), 0 }
  0x2a   : > { %s360_s9 = scalar_select %p748_p5, [#allocation4], [#allocation10] }
  0x2b   : > { %p355_p4 = scmp.ge.s32.totalorder %s634_s29, 1  ;;  %p198_p6 = scmp.lt.s32.totalorder %s634_s29, 17 }
  0x2c   : > { %s925_s9 = smov (!%p376_p2, %s360_s9), [#allocation11]  ;;  %s178_s14 = scalar_lea.vmem [#allocation6], %s175_s30 }
  0x2d   : > { %s186_s5 = sld [smem:[%s925_s9 + %s927_s13]]  ;;  %s193_s8 = sshll.u32 %s178_s14, 4  ;;  %s194_s8 = int_to_ptr.vmem [resolvable:$true] %s193_s8 }
  0x2e   : > { %p798_p8 = pnand %p355_p4, %p198_p6  ;;  %s176_s20 = scalar_lea.sflag [#allocation7], %s175_s30 }
  0x2f   : > { %p484_p9 = pneg %p787_p3  ;;  %s487_s14 = scalar_lea.hbm %s884_s1, 32 }
  0x33   : > { %s189_s7 = scalar_lea.hbm %s884_s1, %s186_s5 }
  0x34   : > { %s191_s6 = sshll.u32 %s189_s7, 4  ;;  %s192_s6 = int_to_ptr.hbm [resolvable:$true] %s191_s6 }
  0x35   : > { %s480_s28 = sshra.s32 %s192_s6, 4  ;;  %s481_s28 = int_to_ptr.hbm [resolvable:$true] %s480_s28 }
  0x36   : > { %s482_s27 = scalar_lea.hbm %s481_s28, 1  ;;  %p488_p13 = scmp.lt.s32.totalorder %s481_s28, %s884_s1 }
  0x37   : > { %p483_p5 = scmp.ne.s32.totalorder %s481_s28, %s482_s27  ;;  %p489_p0 = scmp.lt.s32.totalorder %s487_s14, %s482_s27 }
  0x39   : > { %p485_p10 = pnand %p484_p9, %p483_p5  ;;  %p490_p2 = por %p489_p0, %p488_p13 }
  0x3b   : > { %p486_p12 = pneg %p485_p10 }
  0x3d   : > { %p491_p4 = pnand %p490_p2, %p486_p12 }
  0x3f   : > { %494 = shalt.err (!%p491_p4)
}
  0x40   : > { %371 = dma.hbm_to_vmem [thread:$0]  (!%p787_p3), %s192_s6, 16, %s194_s8, %s176_s20  }
  0x41   : > { %202 = sbr.rel (%p798_p8) target bundleno = 235 (0xeb), region = 32  ;;  %s204_s7 = sand.u32 (!%p798_p8), 1, %s610_s24  }
  0x42   : > { %s205_s30 = scalar_lea.sflag (!%p798_p8), [#allocation7], %s204_s7  ;;  %s207_s5 = scalar_lea.vmem (!%p798_p8), [#allocation6], %s204_s7 }
  0x46   : > { %585 = dma.done.wait (%p757_p7), %s205_s30, 16  }
  0x47   : > { %587 = vsyncadd (%p757_p7), %s205_s30, 4294967280  ;;  %s227_s3 = sand.u32 1, %s598_s22   ;;  %p356_p3 = scmp.ne.s32.totalorder %s618_s25, 0 }
  0x48   : > { %s228_s27 = scalar_lea.vmem [#allocation9], %s227_s3 }
  0x49   : > { %240 = sbr.rel (%p356_p3) target bundleno = 80 (0x50), region = 40 }
  0x4e   : > { %v637_v0 = vmov 0.0  }
  0x4f   : > { %241 = vst [vmem:[#allocation2] sm:$0x1] %v637_v0 }
  0x50 PF: > { %v243_v2 = vld [vmem:[%s207_s5] sm:$0x1]  ;;  %p357_p6 = scmp.ne.s32.totalorder %s618_s25, 7 }
  0x51   : > { %s258_s11 = sld [smem:[#allocation5]] (!%p357_p6) }
  0x55   : > { %249 = sbr.rel (%p357_p6) target bundleno = 221 (0xdd), region = 44 }
  0x56   : > { %v242_v1 = vld [vmem:[#allocation2] sm:$0x1] }
  0x57   : > { %v244_v3 = vadd.f32 %v243_v2, %v242_v1 }
  0x59   : > { %245 = vst [vmem:[#allocation2] sm:$0x1] %v244_v3 }
  0x5a   : > { %v252_v5 = vld [vmem:[%s885_s2] sm:$0x1]  ;;  %vm254_vm0 = vcmask 1040384   ;;  %v259_v9 = vstv %s258_s11 }
  0x60   : > { %v250_v4 = vld [vmem:[#allocation2] sm:$0x1] }
  0x61   : > { %v251_v6 = vmul.f32 0.125, %v250_v4 }
  0x63   : > { %v253_v7 = vmul.f32 %v252_v5, %v251_v6 }
  0x65   : > { %v255_v8 = vsel %vm254_vm0, %v253_v7, 0.0 }
  0x66   : > { %256 = vadd.xlane.f32.xlu0 %v255_v8 }
  0xd9   : > { %v257_v10 = vpop.xlane.xlu0 %256 }
  0xda   : > { %v260_v11 = vadd.f32 %v259_v9, %v257_v10 }
  0xdc   : > { %261 = vst [vmem:[%s228_s27] sm:$0x1] %v260_v11 }
  0xdd PF: > { %s271_s19 = scalar_lea.hbm %s887_s4, %s622_s26  ;;  %s273_s8 = sshll.u32 %s228_s27, 4  ;;  %s274_s8 = int_to_ptr.vmem [resolvable:$true] %s273_s8 }
  0xde   : > { %s275_s16 = sshll.u32 %s271_s19, 4  ;;  %s263_s10 = scalar_lea.sflag [#allocation8], %s227_s3  ;;  %s276_s16 = int_to_ptr.hbm [resolvable:$true] %s275_s16 }
  0xdf   : > { %s524_s15 = sshra.s32 %s276_s16, 4  ;;  %s530_s14 = scalar_lea.hbm %s887_s4, 2  ;;  %s525_s15 = int_to_ptr.hbm [resolvable:$true] %s524_s15 }
  0xe0   : > { %s526_s20 = scalar_lea.hbm %s525_s15, 1  ;;  %p531_p9 = scmp.lt.s32.totalorder %s525_s15, %s887_s4 }
  0xe1   : > { %p527_p7 = scmp.ne.s32.totalorder %s525_s15, %s526_s20  ;;  %p532_p10 = scmp.lt.s32.totalorder %s530_s14, %s526_s20 }
  0xe3   : > { %p528_p8 = pnand %p527_p7, %p768_p11  ;;  %p533_p12 = por %p532_p10, %p531_p9 }
  0xe5   : > { %p529_p5 = pneg %p528_p8 }
  0xe7   : > { %p534_p13 = pnand %p533_p12, %p529_p5 }
  0xe9   : > { %537 = shalt.err (!%p534_p13)
}
  0xea   : > { %364 = dma.vmem_to_hbm [thread:$0]  (%p768_p11), %s274_s8, 16, %s276_s16, %s263_s10  }
  0xeb PF: > { %p377_p0 = scmp.ge.s32.totalorder %s634_s29, 2  ;;  %s287_s26 = sand.u32 1, %s594_s21  }
  0xec   : > { %s288_s5 = scalar_lea.sflag [#allocation8], %s287_s26 }
  0xed   : > { %p373_p2 = pnand %p377_p0, %p776_p1 }
  0xef   : > { %p374_p4 = pneg %p373_p2 }
  0xf1   : > { %589 = dma.done.wait (%p374_p4), %s288_s5, 16  }
  0xf2   : > { %591 = vsyncadd (%p374_p4), %s288_s5, 4294967280  ;;  %s29_s29 = sadd.s32 1, %s634_s29   ;;  %s905_s12 = sld [smem:[#allocation15_spill]] }
  0xf3   : > { %p26_p3 = scmp.ge.s32.totalorder %s29_s29, 18   ;;  %s906_s3 = sld [smem:[#allocation20_spill]] }
  0xf4   : > { %s907_s25 = sld [smem:[#allocation16_spill]]  ;;  %s911_s21 = smov %s598_s22 }
  0xf5   : > { %s908_s26 = sld [smem:[#allocation17_spill]]  ;;  %s912_s22 = smov %s602_s23 }
  0xf6   : > { %s909_s27 = sld [smem:[#allocation18_spill]]  ;;  %s913_s23 = smov %s766_s0 }
  0xf7   : > { %s910_s28 = sld [smem:[#allocation19_spill]]  ;;  %s914_s0 = smov %s610_s24 }
  0xf8   : > { %s915_s24 = smov %s905_s12  ;;  %28 = sbr.rel (!%p26_p3) target bundleno = 15 (0xf), region = 85 }
  0xfd   :  { %293 = vsyncpa [#allocation7], 1 }
  0xfe   :  { %295 = vsyncpa [#allocation7 + $0x1], 1 }
  0xff   :  { %296 = vsyncpa [#allocation8], 1 }
 0x100   :  { %298 = vsyncpa [#allocation8 + $0x1], 1 }

</bundles_post_ra>
